<compile_context>
chip_gen: v6e
topology: v6e:2x2x1
jax: 0.10.0
libtpu: 0.0.40
codegen_flags: <defaults>
</compile_context>

<pallas_src>
import jax
import jax.numpy as jnp
from jax.experimental import pallas as pl
from jax.experimental.pallas import tpu as pltpu


def _round_up(x, m):
    return ((x + m - 1) // m) * m


def make_discriminator_kernel(num_layers):
    """Fused MLP kernel for `num_layers` Linear layers.

    Kernel ref order: x_ref, w0, b0, w1, b1, ..., out_ref.
    LeakyReLU(0.2) follows every layer except the last.
    Dropout(0.5) is inference-mode identity.
    """

    def kernel(*refs):
        x_ref = refs[0]
        out_ref = refs[-1]
        wb_refs = refs[1:-1]
        assert len(wb_refs) == 2 * num_layers

        h = x_ref[...]                                   # bf16 (tr, pacdim_p)
        for i in range(num_layers):
            w = wb_refs[2 * i][...]                      # bf16 (in_p, out_p), VMEM-resident
            b = wb_refs[2 * i + 1][...]                  # f32  (1, out_p) -> broadcasts over rows
            # bf16 MXU operands, f32 accumulation; bias add in f32 on the VPU.
            acc = jnp.dot(h, w, preferred_element_type=jnp.float32) + b
            if i < num_layers - 1:
                # LeakyReLU(0.2) as a single max, fused with the next layer's
                # bf16 operand cast (reduces vreg pressure across the unroll).
                h = jnp.maximum(acc, 0.2 * acc).astype(jnp.bfloat16)
                # TODO(synk): Dropout(0.5) is identity (inference mode); training-mode
                # RNG-matched dropout vs torch is not reproducible here.
            else:
                out_ref[...] = acc.astype(out_ref.dtype)

    return kernel


def init_discriminator_params(key, input_dim, discriminator_dim, pac):
    """Deterministic init mimicking torch.nn.Linear defaults (uniform +/- 1/sqrt(fan_in))."""
    dims = [input_dim * pac] + list(discriminator_dim) + [1]
    params = []
    for i in range(len(dims) - 1):
        fan_in, fan_out = dims[i], dims[i + 1]
        key, kw, kb = jax.random.split(key, 3)
        bound = 1.0 / jnp.sqrt(fan_in)
        # stored transposed: (in, out)
        w = jax.random.uniform(kw, (fan_in, fan_out), jnp.float32, -bound, bound)
        b = jax.random.uniform(kb, (1, fan_out), jnp.float32, -bound, bound)
        params.append((w, b))
    return params


def _pad_params(params):
    """Zero-pad weights/biases to lane-aligned (multiple-of-128) feature dims.

    Weights are cast to bf16 (MXU operands); biases stay f32 (VPU add).
    Zero-padded columns propagate zeros through bias (padded with 0) and
    LeakyReLU(0)=0, so padded lanes never contaminate real outputs.
    """
    padded = []
    for w, b in params:
        fin, fout = w.shape
        fin_p = _round_up(fin, 128)
        fout_p = _round_up(fout, 128)
        wp = jnp.zeros((fin_p, fout_p), jnp.float32).at[:fin, :fout].set(w)
        bp = jnp.zeros((1, fout_p), jnp.float32).at[:, :fout].set(b)
        padded.append((wp.astype(jnp.bfloat16), bp))
    return padded


def _choose_tile_rows(rows_aligned, pacdim_p, out_p, weight_bytes, tile_rows):
    """Row tile: >= ~4 grid steps when the batch allows, capped by a VMEM budget.

    bf16 rows pack 16 per sublane tile, so everything is kept a multiple of 16.
    The VMEM budget (32 MiB) keeps double-buffered bf16 activation tiles plus
    the resident weights comfortably inside v7x's 64 MiB physical VMEM while
    still allowing large tiles on v5e/v6e (128 MiB).
    """
    tr = min(tile_rows, _round_up(-(-rows_aligned // 4), 16))
    tr = max(tr, 16)
    budget = 32 * 1024 * 1024
    per_row = 2 * pacdim_p * 2 + 2 * out_p * 2          # dbl-buffered bf16 in + out per row
    avail = budget - weight_bytes
    if avail > 0:
        cap = max(16, (avail // per_row) // 16 * 16)
        tr = min(tr, cap)
    return int(tr)


def discriminator_forward(x, params, pac, tile_rows=1024):
    """Pallas implementation of Discriminator.forward.

    x: (batch, input_dim) float32, batch % pac == 0
    returns: (batch // pac, 1) float32

    NOTE(perf): for typical CTGAN batches (rows ~ 50) a single call is
    launch/DMA-latency bound; callers should concatenate real/fake/interpolated
    rows into ONE call per generator step instead of three separate launches.
    """
    batch, input_dim = x.shape
    assert batch % pac == 0
    rows = batch // pac
    pacdim = input_dim * pac

    # Equivalent of input_.view(-1, self.pacdim)
    xp = x.reshape(rows, pacdim)

    # ---- pad to TPU-friendly shapes -------------------------------------
    padded_params = _pad_params(params)
    num_layers = len(params)
    pacdim_p = padded_params[0][0].shape[0]
    out_p = padded_params[-1][0].shape[1]                # 128 (final layer padded from 1)
    weight_bytes = sum(int(w.size) * 2 + int(b.size) * 4 for w, b in padded_params)

    rows_aligned = _round_up(max(rows, 1), 16)           # bf16 sublane tile = 16 rows
    tr = _choose_tile_rows(rows_aligned, pacdim_p, out_p, weight_bytes, tile_rows)
    rows_p = _round_up(rows_aligned, tr)
    grid = (rows_p // tr,)

    # bf16 activation stream (halves HBM bytes + VMEM footprint of the input tile).
    x_pad = jnp.zeros((rows_p, pacdim_p), jnp.bfloat16).at[:rows, :pacdim].set(
        xp.astype(jnp.bfloat16))

    flat_params = []
    for w, b in padded_params:
        flat_params.append(w)
        flat_params.append(b)

    kernel = make_discriminator_kernel(num_layers)

    flops = 2 * rows_p * sum(int(w.shape[0]) * int(w.shape[1]) for w, _ in padded_params)
    bytes_accessed = (
        int(x_pad.size) * 2                               # bf16 input stream
        + weight_bytes                                    # bf16 weights + f32 biases
        + rows_p * out_p * 2                              # bf16 output write
    )
    cost = pl.CostEstimate(flops=flops, transcendentals=0,
                           bytes_accessed=int(bytes_accessed))

    vmem_needed = weight_bytes + 2 * tr * pacdim_p * 2 + 2 * tr * out_p * 2 + (1 << 20)
    vmem_limit = int(min(48 * 1024 * 1024, max(32 * 1024 * 1024, vmem_needed + (4 << 20))))

    def _build_and_call(single_buffer_weights):
        in_specs = [pl.BlockSpec((tr, pacdim_p), lambda i: (i, 0))]
        for w, b in padded_params:
            if single_buffer_weights:
                # Constant index map -> VMEM-resident; no need to double-buffer.
                wspec = pl.BlockSpec(w.shape, lambda i: (0, 0),
                                     pipeline_mode=pl.Buffered(1))
                bspec = pl.BlockSpec(b.shape, lambda i: (0, 0),
                                     pipeline_mode=pl.Buffered(1))
            else:
                wspec = pl.BlockSpec(w.shape, lambda i: (0, 0))
                bspec = pl.BlockSpec(b.shape, lambda i: (0, 0))
            in_specs.append(wspec)
            in_specs.append(bspec)

        out_specs = pl.BlockSpec((tr, out_p), lambda i: (i, 0))

        return pl.pallas_call(
            kernel,
            out_shape=jax.ShapeDtypeStruct((rows_p, out_p), jnp.bfloat16),
            grid=grid,
            in_specs=in_specs,
            out_specs=out_specs,
            compiler_params=pltpu.CompilerParams(
                dimension_semantics=("parallel",),
                vmem_limit_bytes=vmem_limit,
            ),
            cost_estimate=cost,
        )(x_pad, *flat_params)

    try:
        out = _build_and_call(single_buffer_weights=True)
    except Exception:
        # Fallback if this runtime rejects pl.Buffered(1) for resident operands.
        out = _build_and_call(single_buffer_weights=False)

    # Strip row padding and the lane padding of the final (out_features=1) layer;
    # return f32 logits like the torch module.
    return out[:rows, :1].astype(jnp.float32)


def discriminator_forward_ref_bf16(x, params, pac):
    """Pure-JAX reference mimicking the kernel numerics (bf16 operands, f32 acc, bf16 out)."""
    batch, input_dim = x.shape
    h = x.reshape(batch // pac, input_dim * pac).astype(jnp.bfloat16)
    n = len(params)
    for i, (w, b) in enumerate(params):
        h = jnp.dot(h.astype(jnp.bfloat16), w.astype(jnp.bfloat16),
                    preferred_element_type=jnp.float32) + b
        if i < n - 1:
            h = jnp.maximum(h, 0.2 * h).astype(jnp.bfloat16)
    return h.astype(jnp.bfloat16).astype(jnp.float32)


def discriminator_forward_ref_f32(x, params, pac):
    """Pure-f32 reference (exact torch semantics, inference mode)."""
    batch, input_dim = x.shape
    h = x.reshape(batch // pac, input_dim * pac)
    n = len(params)
    for i, (w, b) in enumerate(params):
        h = h @ w + b
        if i < n - 1:
            h = jnp.where(h > 0, h, 0.2 * h)
    return h


if __name__ == "__main__":
    key = jax.random.PRNGKey(0)

    # Small shapes consistent with the module: batch divisible by pac (default pac=10).
    batch = 40
    input_dim = 12
    pac = 10
    discriminator_dim = (64, 64)

    kx, kp = jax.random.split(key)
    x = jax.random.normal(kx, (batch, input_dim), jnp.float32)
    params = init_discriminator_params(kp, input_dim, discriminator_dim, pac)

    out = discriminator_forward(x, params, pac)
    out = jax.block_until_ready(out)

    assert out.shape == (batch // pac, 1)

    # Check against a reference with matching bf16 numerics (tight tol) ...
    ref_bf16 = discriminator_forward_ref_bf16(x, params, pac)
    assert jnp.allclose(out, ref_bf16, atol=2e-3, rtol=2e-3), (out, ref_bf16)

    # ... and against the exact f32 math (loose tol: bf16 operands + bf16 output cast).
    ref_f32 = discriminator_forward_ref_f32(x, params, pac)
    assert jnp.allclose(out, ref_f32, atol=5e-2, rtol=5e-2), (out, ref_f32)

    print("KERNEL_OK")
</pallas_src>

<mosaic_0001>
module attributes {stable_mosaic.version = 11 : i64} {
  func.func @kernel(%arg0: i32, %arg1: memref<16x128xbf16, #tpu.memory_space<vmem>>, %arg2: memref<128x128xbf16, #tpu.memory_space<vmem>>, %arg3: memref<1x128xf32, #tpu.memory_space<vmem>>, %arg4: memref<128x128xbf16, #tpu.memory_space<vmem>>, %arg5: memref<1x128xf32, #tpu.memory_space<vmem>>, %arg6: memref<128x128xbf16, #tpu.memory_space<vmem>>, %arg7: memref<1x128xf32, #tpu.memory_space<vmem>>, %arg8: memref<16x128xbf16, #tpu.memory_space<vmem>>) attributes {dimension_semantics = [#tpu.dimension_semantics<parallel>], iteration_bounds = array<i64: 1>, scalar_prefetch = 0 : i64, scratch_operands = 0 : i64, tpu.core_type = #tpu.core_type<tc>, window_params = [{transform_indices = @transform_0, window_bounds = array<i64: 16, 128>}, {pipeline_mode = #tpu.pipeline_mode<synchronous>, transform_indices = @transform_1, window_bounds = array<i64: 128, 128>}, {pipeline_mode = #tpu.pipeline_mode<synchronous>, transform_indices = @transform_2, window_bounds = array<i64: 1, 128>}, {pipeline_mode = #tpu.pipeline_mode<synchronous>, transform_indices = @transform_3, window_bounds = array<i64: 128, 128>}, {pipeline_mode = #tpu.pipeline_mode<synchronous>, transform_indices = @transform_4, window_bounds = array<i64: 1, 128>}, {pipeline_mode = #tpu.pipeline_mode<synchronous>, transform_indices = @transform_5, window_bounds = array<i64: 128, 128>}, {pipeline_mode = #tpu.pipeline_mode<synchronous>, transform_indices = @transform_6, window_bounds = array<i64: 1, 128>}, {transform_indices = @transform_7, window_bounds = array<i64: 16, 128>}]} {
    %c0 = arith.constant 0 : index
    %c0_0 = arith.constant 0 : index
    %0 = vector.load %arg1[%c0, %c0_0] : memref<16x128xbf16, #tpu.memory_space<vmem>>, vector<16x128xbf16>
    %c0_1 = arith.constant 0 : index
    %c0_2 = arith.constant 0 : index
    %1 = vector.load %arg2[%c0_1, %c0_2] : memref<128x128xbf16, #tpu.memory_space<vmem>>, vector<128x128xbf16>
    %c0_3 = arith.constant 0 : index
    %c0_4 = arith.constant 0 : index
    %2 = vector.load %arg3[%c0_3, %c0_4] : memref<1x128xf32, #tpu.memory_space<vmem>>, vector<1x128xf32>
    %cst = arith.constant dense<0.000000e+00> : vector<16x128xf32>
    %3 = tpu.matmul %0, %1, %cst {dimension_numbers = #tpu.dot_dimension_numbers<[1], [0], [0], [1], [0, 0, 1, 1], [], []>} : vector<16x128xbf16>, vector<128x128xbf16>, vector<16x128xf32> -> vector<16x128xf32>
    %4 = vector.broadcast %2 : vector<1x128xf32> to vector<16x128xf32>
    %5 = arith.addf %3, %4 : vector<16x128xf32>
    %cst_5 = arith.constant 2.000000e-01 : f32
    %6 = vector.broadcast %cst_5 : f32 to vector<16x128xf32>
    %7 = arith.mulf %6, %5 : vector<16x128xf32>
    %8 = arith.maximumf %5, %7 : vector<16x128xf32>
    %9 = arith.truncf %8 : vector<16x128xf32> to vector<16x128xbf16>
    %c0_6 = arith.constant 0 : index
    %c0_7 = arith.constant 0 : index
    %10 = vector.load %arg4[%c0_6, %c0_7] : memref<128x128xbf16, #tpu.memory_space<vmem>>, vector<128x128xbf16>
    %c0_8 = arith.constant 0 : index
    %c0_9 = arith.constant 0 : index
    %11 = vector.load %arg5[%c0_8, %c0_9] : memref<1x128xf32, #tpu.memory_space<vmem>>, vector<1x128xf32>
    %cst_10 = arith.constant dense<0.000000e+00> : vector<16x128xf32>
    %12 = tpu.matmul %9, %10, %cst_10 {dimension_numbers = #tpu.dot_dimension_numbers<[1], [0], [0], [1], [0, 0, 1, 1], [], []>} : vector<16x128xbf16>, vector<128x128xbf16>, vector<16x128xf32> -> vector<16x128xf32>
    %13 = vector.broadcast %11 : vector<1x128xf32> to vector<16x128xf32>
    %14 = arith.addf %12, %13 : vector<16x128xf32>
    %cst_11 = arith.constant 2.000000e-01 : f32
    %15 = vector.broadcast %cst_11 : f32 to vector<16x128xf32>
    %16 = arith.mulf %15, %14 : vector<16x128xf32>
    %17 = arith.maximumf %14, %16 : vector<16x128xf32>
    %18 = arith.truncf %17 : vector<16x128xf32> to vector<16x128xbf16>
    %c0_12 = arith.constant 0 : index
    %c0_13 = arith.constant 0 : index
    %19 = vector.load %arg6[%c0_12, %c0_13] : memref<128x128xbf16, #tpu.memory_space<vmem>>, vector<128x128xbf16>
    %c0_14 = arith.constant 0 : index
    %c0_15 = arith.constant 0 : index
    %20 = vector.load %arg7[%c0_14, %c0_15] : memref<1x128xf32, #tpu.memory_space<vmem>>, vector<1x128xf32>
    %cst_16 = arith.constant dense<0.000000e+00> : vector<16x128xf32>
    %21 = tpu.matmul %18, %19, %cst_16 {dimension_numbers = #tpu.dot_dimension_numbers<[1], [0], [0], [1], [0, 0, 1, 1], [], []>} : vector<16x128xbf16>, vector<128x128xbf16>, vector<16x128xf32> -> vector<16x128xf32>
    %22 = vector.broadcast %20 : vector<1x128xf32> to vector<16x128xf32>
    %23 = arith.addf %21, %22 : vector<16x128xf32>
    %24 = arith.truncf %23 : vector<16x128xf32> to vector<16x128xbf16>
    %c0_17 = arith.constant 0 : index
    %c0_18 = arith.constant 0 : index
    %25 = vector.load %arg8[%c0_17, %c0_18] : memref<16x128xbf16, #tpu.memory_space<vmem>>, vector<16x128xbf16>
    tpu.vector_store %arg8[%c0_17, %c0_18], %24 {strides = array<i32>} : memref<16x128xbf16, #tpu.memory_space<vmem>>, vector<16x128xbf16>,
    return
  }
  func.func @transform_0(%arg0: i32) -> (i32, i32) {
    %c0_i32 = arith.constant 0 : i32
    %c0_i32_0 = arith.constant 0 : i32
    return %arg0, %c0_i32 : i32, i32
  }
  func.func @transform_1(%arg0: i32) -> (i32, i32) {
    %c0_i32 = arith.constant 0 : i32
    %c0_i32_0 = arith.constant 0 : i32
    %c0_i32_1 = arith.constant 0 : i32
    return %c0_i32, %c0_i32_0 : i32, i32
  }
  func.func @transform_2(%arg0: i32) -> (i32, i32) {
    %c0_i32 = arith.constant 0 : i32
    %c0_i32_0 = arith.constant 0 : i32
    %c0_i32_1 = arith.constant 0 : i32
    return %c0_i32, %c0_i32_0 : i32, i32
  }
  func.func @transform_3(%arg0: i32) -> (i32, i32) {
    %c0_i32 = arith.constant 0 : i32
    %c0_i32_0 = arith.constant 0 : i32
    %c0_i32_1 = arith.constant 0 : i32
    return %c0_i32, %c0_i32_0 : i32, i32
  }
  func.func @transform_4(%arg0: i32) -> (i32, i32) {
    %c0_i32 = arith.constant 0 : i32
    %c0_i32_0 = arith.constant 0 : i32
    %c0_i32_1 = arith.constant 0 : i32
    return %c0_i32, %c0_i32_0 : i32, i32
  }
  func.func @transform_5(%arg0: i32) -> (i32, i32) {
    %c0_i32 = arith.constant 0 : i32
    %c0_i32_0 = arith.constant 0 : i32
    %c0_i32_1 = arith.constant 0 : i32
    return %c0_i32, %c0_i32_0 : i32, i32
  }
  func.func @transform_6(%arg0: i32) -> (i32, i32) {
    %c0_i32 = arith.constant 0 : i32
    %c0_i32_0 = arith.constant 0 : i32
    %c0_i32_1 = arith.constant 0 : i32
    return %c0_i32, %c0_i32_0 : i32, i32
  }
  func.func @transform_7(%arg0: i32) -> (i32, i32) {
    %c0_i32 = arith.constant 0 : i32
    %c0_i32_0 = arith.constant 0 : i32
    return %arg0, %c0_i32 : i32, i32
  }
}

module attributes {stable_mosaic.version = 11 : i64} {
  func.func @kernel(%arg0: i32, %arg1: memref<16x128xbf16, #tpu.memory_space<vmem>>, %arg2: memref<128x128xbf16, #tpu.memory_space<vmem>>, %arg3: memref<1x128xf32, #tpu.memory_space<vmem>>, %arg4: memref<128x128xbf16, #tpu.memory_space<vmem>>, %arg5: memref<1x128xf32, #tpu.memory_space<vmem>>, %arg6: memref<128x128xbf16, #tpu.memory_space<vmem>>, %arg7: memref<1x128xf32, #tpu.memory_space<vmem>>, %arg8: memref<16x128xbf16, #tpu.memory_space<vmem>>) attributes {dimension_semantics = [#tpu.dimension_semantics<parallel>], iteration_bounds = array<i64: 1>, scalar_prefetch = 0 : i64, scratch_operands = 0 : i64, tpu.core_type = #tpu.core_type<tc>, window_params = [{transform_indices = @transform_0, window_bounds = array<i64: 16, 128>}, {pipeline_mode = #tpu.pipeline_mode<synchronous>, transform_indices = @transform_1, window_bounds = array<i64: 128, 128>}, {pipeline_mode = #tpu.pipeline_mode<synchronous>, transform_indices = @transform_2, window_bounds = array<i64: 1, 128>}, {pipeline_mode = #tpu.pipeline_mode<synchronous>, transform_indices = @transform_3, window_bounds = array<i64: 128, 128>}, {pipeline_mode = #tpu.pipeline_mode<synchronous>, transform_indices = @transform_4, window_bounds = array<i64: 1, 128>}, {pipeline_mode = #tpu.pipeline_mode<synchronous>, transform_indices = @transform_5, window_bounds = array<i64: 128, 128>}, {pipeline_mode = #tpu.pipeline_mode<synchronous>, transform_indices = @transform_6, window_bounds = array<i64: 1, 128>}, {transform_indices = @transform_7, window_bounds = array<i64: 16, 128>}]} {
    %c0 = arith.constant 0 : index
    %c0_0 = arith.constant 0 : index
    %0 = vector.load %arg1[%c0, %c0_0] : memref<16x128xbf16, #tpu.memory_space<vmem>>, vector<16x128xbf16>
    %c0_1 = arith.constant 0 : index
    %c0_2 = arith.constant 0 : index
    %1 = vector.load %arg2[%c0_1, %c0_2] : memref<128x128xbf16, #tpu.memory_space<vmem>>, vector<128x128xbf16>
    %c0_3 = arith.constant 0 : index
    %c0_4 = arith.constant 0 : index
    %2 = vector.load %arg3[%c0_3, %c0_4] : memref<1x128xf32, #tpu.memory_space<vmem>>, vector<1x128xf32>
    %cst = arith.constant dense<0.000000e+00> : vector<16x128xf32>
    %3 = tpu.matmul %0, %1, %cst {dimension_numbers = #tpu.dot_dimension_numbers<[1], [0], [0], [1], [0, 0, 1, 1], [], []>} : vector<16x128xbf16>, vector<128x128xbf16>, vector<16x128xf32> -> vector<16x128xf32>
    %4 = vector.broadcast %2 : vector<1x128xf32> to vector<16x128xf32>
    %5 = arith.addf %3, %4 : vector<16x128xf32>
    %cst_5 = arith.constant 2.000000e-01 : f32
    %6 = vector.broadcast %cst_5 : f32 to vector<16x128xf32>
    %7 = arith.mulf %6, %5 : vector<16x128xf32>
    %8 = arith.maximumf %5, %7 : vector<16x128xf32>
    %9 = arith.truncf %8 : vector<16x128xf32> to vector<16x128xbf16>
    %c0_6 = arith.constant 0 : index
    %c0_7 = arith.constant 0 : index
    %10 = vector.load %arg4[%c0_6, %c0_7] : memref<128x128xbf16, #tpu.memory_space<vmem>>, vector<128x128xbf16>
    %c0_8 = arith.constant 0 : index
    %c0_9 = arith.constant 0 : index
    %11 = vector.load %arg5[%c0_8, %c0_9] : memref<1x128xf32, #tpu.memory_space<vmem>>, vector<1x128xf32>
    %cst_10 = arith.constant dense<0.000000e+00> : vector<16x128xf32>
    %12 = tpu.matmul %9, %10, %cst_10 {dimension_numbers = #tpu.dot_dimension_numbers<[1], [0], [0], [1], [0, 0, 1, 1], [], []>} : vector<16x128xbf16>, vector<128x128xbf16>, vector<16x128xf32> -> vector<16x128xf32>
    %13 = vector.broadcast %11 : vector<1x128xf32> to vector<16x128xf32>
    %14 = arith.addf %12, %13 : vector<16x128xf32>
    %cst_11 = arith.constant 2.000000e-01 : f32
    %15 = vector.broadcast %cst_11 : f32 to vector<16x128xf32>
    %16 = arith.mulf %15, %14 : vector<16x128xf32>
    %17 = arith.maximumf %14, %16 : vector<16x128xf32>
    %18 = arith.truncf %17 : vector<16x128xf32> to vector<16x128xbf16>
    %c0_12 = arith.constant 0 : index
    %c0_13 = arith.constant 0 : index
    %19 = vector.load %arg6[%c0_12, %c0_13] : memref<128x128xbf16, #tpu.memory_space<vmem>>, vector<128x128xbf16>
    %c0_14 = arith.constant 0 : index
    %c0_15 = arith.constant 0 : index
    %20 = vector.load %arg7[%c0_14, %c0_15] : memref<1x128xf32, #tpu.memory_space<vmem>>, vector<1x128xf32>
    %cst_16 = arith.constant dense<0.000000e+00> : vector<16x128xf32>
    %21 = tpu.matmul %18, %19, %cst_16 {dimension_numbers = #tpu.dot_dimension_numbers<[1], [0], [0], [1], [0, 0, 1, 1], [], []>} : vector<16x128xbf16>, vector<128x128xbf16>, vector<16x128xf32> -> vector<16x128xf32>
    %22 = vector.broadcast %20 : vector<1x128xf32> to vector<16x128xf32>
    %23 = arith.addf %21, %22 : vector<16x128xf32>
    %24 = arith.truncf %23 : vector<16x128xf32> to vector<16x128xbf16>
    %c0_17 = arith.constant 0 : index
    %c0_18 = arith.constant 0 : index
    %25 = vector.load %arg8[%c0_17, %c0_18] : memref<16x128xbf16, #tpu.memory_space<vmem>>, vector<16x128xbf16>
    tpu.vector_store %arg8[%c0_17, %c0_18], %24 {strides = array<i32>} : memref<16x128xbf16, #tpu.memory_space<vmem>>, vector<16x128xbf16>,
    return
  }
  func.func @transform_0(%arg0: i32) -> (i32, i32) {
    %c0_i32 = arith.constant 0 : i32
    %c0_i32_0 = arith.constant 0 : i32
    return %arg0, %c0_i32 : i32, i32
  }
  func.func @transform_1(%arg0: i32) -> (i32, i32) {
    %c0_i32 = arith.constant 0 : i32
    %c0_i32_0 = arith.constant 0 : i32
    %c0_i32_1 = arith.constant 0 : i32
    return %c0_i32, %c0_i32_0 : i32, i32
  }
  func.func @transform_2(%arg0: i32) -> (i32, i32) {
    %c0_i32 = arith.constant 0 : i32
    %c0_i32_0 = arith.constant 0 : i32
    %c0_i32_1 = arith.constant 0 : i32
    return %c0_i32, %c0_i32_0 : i32, i32
  }
  func.func @transform_3(%arg0: i32) -> (i32, i32) {
    %c0_i32 = arith.constant 0 : i32
    %c0_i32_0 = arith.constant 0 : i32
    %c0_i32_1 = arith.constant 0 : i32
    return %c0_i32, %c0_i32_0 : i32, i32
  }
  func.func @transform_4(%arg0: i32) -> (i32, i32) {
    %c0_i32 = arith.constant 0 : i32
    %c0_i32_0 = arith.constant 0 : i32
    %c0_i32_1 = arith.constant 0 : i32
    return %c0_i32, %c0_i32_0 : i32, i32
  }
  func.func @transform_5(%arg0: i32) -> (i32, i32) {
    %c0_i32 = arith.constant 0 : i32
    %c0_i32_0 = arith.constant 0 : i32
    %c0_i32_1 = arith.constant 0 : i32
    return %c0_i32, %c0_i32_0 : i32, i32
  }
  func.func @transform_6(%arg0: i32) -> (i32, i32) {
    %c0_i32 = arith.constant 0 : i32
    %c0_i32_0 = arith.constant 0 : i32
    %c0_i32_1 = arith.constant 0 : i32
    return %c0_i32, %c0_i32_0 : i32, i32
  }
  func.func @transform_7(%arg0: i32) -> (i32, i32) {
    %c0_i32 = arith.constant 0 : i32
    %c0_i32_0 = arith.constant 0 : i32
    return %arg0, %c0_i32 : i32, i32
  }
}

</mosaic_0001>

<bundles_post_ra>
// kernel: tpu_custom_call.1
= control target key start
LH: loop header
LB: loop body
LE: loop exit
PB: predicated region body
PF: predicated region fallthrough
CT: control target
= control target key end

     0   :  { %12 = vsyncpa [#allocation3], 0  ;;  %s850_s0 = inlined_call_operand.hbm [shape: bf16[16,128], index: 0, kind: input, shape index: {}]   ;;  %s851_s1 = inlined_call_operand.hbm [shape: bf16[128,128], index: 1, kind: input, shape index: {}]   ;;  %s852_s2 = inlined_call_operand.vmem [shape: f32[1,128], index: 2, kind: input, shape index: {}]   ;;  %s853_s3 = inlined_call_operand.hbm [shape: bf16[128,128], index: 3, kind: input, shape index: {}]   ;;  %s854_s4 = inlined_call_operand.vmem [shape: f32[1,128], index: 4, kind: input, shape index: {}]   ;;  %s855_s5 = inlined_call_operand.hbm [shape: bf16[128,128], index: 5, kind: input, shape index: {}]   ;;  %s856_s6 = inlined_call_operand.vmem [shape: f32[1,128], index: 6, kind: input, shape index: {}]   ;;  %s857_s7 = inlined_call_operand.hbm [shape: bf16[16,128], index: 7, kind: output, shape index: {}]  }
   0x1   :  { %13 = vsyncpa [#allocation6], 0 }
   0x2   :  { %14 = vsyncpa [#allocation9], 0 }
   0x3   :  { %15 = vsyncpa [#allocation4], 0  ;;  %s732_s24 = smov [#allocation5]   ;;  %s733_s26 = smov [#allocation2]  }
   0x4   :  { %s33_s25 = sshll.u32 %s732_s24, 4  ;;  %s21_s27 = sshll.u32 %s733_s26, 4  ;;  %s34_s25 = int_to_ptr.vmem [resolvable:$true] %s33_s25  ;;  %s22_s27 = int_to_ptr.vmem [resolvable:$true] %s21_s27 }
   0x5   :  { %s632_s28 = scalar_lea.vmem %s34_s25, 1024  ;;  %p637_p1 = scmp.lt.s32.totalorder %s34_s25, %s34_s25 }
   0x6   :  { %p633_p0 = scmp.ne.s32.totalorder %s34_s25, %s632_s28  ;;  %p638_p2 = scmp.lt.s32.totalorder %s632_s28, %s632_s28 }
   0x8   :  { %p639_p3 = por %p638_p2, %p637_p1 }
   0xa   :  { %p640_p4 = pnand %p639_p3, %p633_p0 }
   0xc   :  { %643 = shalt.err (!%p640_p4)
}
   0xd   :  { %s734_s29 = smov 64   ;;  %s735_s30 = smov 4  }
   0xe   :  { %39 = dma.hbm_to_vmem [thread:$0]  %s851_s1, 1024, %s34_s25, [#allocation6], %s734_s29, %s734_s29, %s735_s30  }
   0xf   :  { %s652_s10 = scalar_lea.vmem %s22_s27, 128  ;;  %p657_p6 = scmp.lt.s32.totalorder %s22_s27, %s22_s27 }
  0x10   :  { %p653_p5 = scmp.ne.s32.totalorder %s22_s27, %s652_s10  ;;  %p658_p7 = scmp.lt.s32.totalorder %s652_s10, %s652_s10 }
  0x12   :  { %p659_p8 = por %p658_p7, %p657_p6 }
  0x14   :  { %p660_p9 = pnand %p659_p8, %p653_p5 }
  0x16   :  { %663 = shalt.err (!%p660_p9)
}
  0x17   :  { %27 = dma.hbm_to_vmem [thread:$0]  %s850_s0, 128, %s22_s27, [#allocation3], %s734_s29, %s734_s29, %s735_s30  }
  0x18   :  { %s736_s13 = smov [#allocation7]   ;;  %s737_s15 = smov [#allocation8]  }
  0x19   :  { %s47_s14 = sshll.u32 %s736_s13, 4  ;;  %s61_s16 = sshll.u32 %s737_s15, 4  ;;  %s48_s14 = int_to_ptr.vmem [resolvable:$true] %s47_s14  ;;  %s62_s16 = int_to_ptr.vmem [resolvable:$true] %s61_s16 }
  0x1a   :  { %s672_s1 = scalar_lea.vmem %s48_s14, 1024  ;;  %p677_p11 = scmp.lt.s32.totalorder %s48_s14, %s48_s14 }
  0x1b   :  { %p673_p10 = scmp.ne.s32.totalorder %s48_s14, %s672_s1  ;;  %p678_p12 = scmp.lt.s32.totalorder %s672_s1, %s672_s1 }
  0x1d   :  { %p679_p13 = por %p678_p12, %p677_p11 }
  0x1f   :  { %p680_p0 = pnand %p679_p13, %p673_p10 }
  0x21   :  { %683 = shalt.err (!%p680_p0)
}
  0x22   :  { %53 = dma.hbm_to_vmem [thread:$0]  %s853_s3, 1024, %s48_s14, [#allocation6], %s734_s29, %s734_s29, %s735_s30  }
  0x23   :  { %s692_s0 = scalar_lea.vmem %s62_s16, 1024  ;;  %p697_p2 = scmp.lt.s32.totalorder %s62_s16, %s62_s16 }
  0x24   :  { %p693_p1 = scmp.ne.s32.totalorder %s62_s16, %s692_s0  ;;  %p698_p3 = scmp.lt.s32.totalorder %s692_s0, %s692_s0 }
  0x26   :  { %p699_p4 = por %p698_p3, %p697_p2 }
  0x28   :  { %p700_p5 = pnand %p699_p4, %p693_p1 }
  0x2a   :  { %703 = shalt.err (!%p700_p5)
}
  0x2b   :  { %67 = dma.hbm_to_vmem [thread:$0]  %s855_s5, 1024, %s62_s16, [#allocation9], %s734_s29, %s734_s29, %s735_s30  }
  0x2c   :  { %724 = dma.done.wait [#allocation3], 128  }
  0x2d   :  { %725 = vsyncadd [#allocation3], 4294967168 }
  0x2e   :  { %726 = dma.done.wait [#allocation6], 2048  }
  0x2f   :  { %727 = vsyncadd [#allocation6], 4294965248 }
  0x30   :  { %728 = dma.done.wait [#allocation9], 1024  }
  0x31   :  { %729 = vsyncadd [#allocation9], 4294966272  ;;  %v738_v0 = vmov 0.0   ;;  %vm739_vm0 = vmmov 0   ;;  %v599_v1 = vld [vmem:[#allocation5 + $0x38] sm:$0xff]   ;;  %v600_v2 = vld [vmem:[#allocation5 + $0x30] sm:$0xff]  }
  0x32   :  { %530 = vmatprep.subr.bf16.mxu0 %v738_v0  ;;  %546 = vmatprep.mubr.msk.bf16.mxu0 %vm739_vm0, %v738_v0  ;;  %v601_v3 = vld [vmem:[#allocation5 + $0x28] sm:$0xff]   ;;  %v608_v4 = vld [vmem:[#allocation7 + $0x38] sm:$0xff]   ;;  %v602_v5 = vld [vmem:[#allocation5 + $0x20] sm:$0xff]  }
  0x33   :  { %550 = vmatprep.subr.bf16.mxu1 %v738_v0  ;;  %566 = vmatprep.mubr.msk.bf16.mxu1 %vm739_vm0, %v738_v0  ;;  %v609_v6 = vld [vmem:[#allocation7 + $0x30] sm:$0xff]   ;;  %v603_v7 = vld [vmem:[#allocation5 + $0x18] sm:$0xff]   ;;  %v610_v8 = vld [vmem:[#allocation7 + $0x28] sm:$0xff]  }
  0x34   :  { %531 = vmatpush3.bf16.msra.mxu0 %v599_v1  ;;  %551 = vmatpush3.bf16.msra.mxu1 %v608_v4  ;;  %v604_v9 = vld [vmem:[#allocation5 + $0x10] sm:$0xff]   ;;  %v611_v10 = vld [vmem:[#allocation7 + $0x20] sm:$0xff]   ;;  %v605_v11 = vld [vmem:[#allocation5 + $0x8] sm:$0xff]  }
  0x35   :  { %532 = vmatprep.subr.bf16.mxu0 %v738_v0  ;;  %552 = vmatprep.subr.bf16.mxu1 %v738_v0  ;;  %v612_v12 = vld [vmem:[#allocation7 + $0x18] sm:$0xff]   ;;  %v606_v13 = vld [vmem:[#allocation5] sm:$0xff]   ;;  %v613_v15 = vld [vmem:[#allocation7 + $0x10] sm:$0xff]  }
  0x36   :  { %v607_v14 = vld [vmem:[#allocation2] sm:$0xff]   ;;  %v614_v16 = vld [vmem:[#allocation7 + $0x8] sm:$0xff]   ;;  %v615_v17 = vld [vmem:[#allocation7] sm:$0xff]  }
  0x37   :  { %v616_v18 = vld [vmem:[#allocation8 + $0x38] sm:$0xff]   ;;  %v617_v19 = vld [vmem:[#allocation8 + $0x30] sm:$0xff]   ;;  %v618_v20 = vld [vmem:[#allocation8 + $0x28] sm:$0xff]  }
  0x38   :  { %533 = vmatpush3.bf16.msra.mxu0 %v600_v2  ;;  %553 = vmatpush3.bf16.msra.mxu1 %v609_v6  ;;  %v619_v21 = vld [vmem:[#allocation8 + $0x20] sm:$0xff]   ;;  %v620_v22 = vld [vmem:[#allocation8 + $0x18] sm:$0xff]   ;;  %v621_v35 = vld [vmem:[#allocation8 + $0x10] sm:$0xff]  }
  0x39   :  { %534 = vmatprep.subr.bf16.mxu0 %v738_v0  ;;  %554 = vmatprep.subr.bf16.mxu1 %v738_v0  ;;  %v466_v23 = vld [vmem:[%s852_s2] ss:$0 sm:$0xff]  ;;  %v622_v36 = vld [vmem:[#allocation8 + $0x8] sm:$0xff]   ;;  %v623_v37 = vld [vmem:[#allocation8] sm:$0xff]  }
  0x3a   :  { %v476_v38 = vld [vmem:[%s854_s4] ss:$0 sm:$0xff]  ;;  %s740_s4 = smov [#allocation10]  }
  0x3b   :  { %v485_v51 = vld [vmem:[%s856_s6] ss:$0 sm:$0xff]  ;;  %s452_s24 = sshll.u32 %s740_s4, 4  ;;  %s453_s24 = int_to_ptr.vmem [resolvable:$true] %s452_s24 }
  0x3c   :  { %535 = vmatpush3.bf16.msra.mxu0 %v601_v3  ;;  %555 = vmatpush3.bf16.msra.mxu1 %v610_v8  ;;  %s704_s25 = scalar_lea.vmem %s453_s24, 128  ;;  %p709_p7 = scmp.lt.s32.totalorder %s453_s24, %s453_s24 }
  0x3d   :  { %536 = vmatprep.subr.bf16.mxu0 %v738_v0  ;;  %556 = vmatprep.subr.bf16.mxu1 %v738_v0  ;;  %p705_p6 = scmp.ne.s32.totalorder %s453_s24, %s704_s25  ;;  %p710_p8 = scmp.lt.s32.totalorder %s704_s25, %s704_s25 }
  0x3f   :  { %p711_p9 = por %p710_p8, %p709_p7 }
  0x40   :  { %537 = vmatpush3.bf16.msra.mxu0 %v602_v5  ;;  %557 = vmatpush3.bf16.msra.mxu1 %v611_v10 }
  0x41   :  { %538 = vmatprep.subr.bf16.mxu0 %v738_v0  ;;  %558 = vmatprep.subr.bf16.mxu1 %v738_v0  ;;  %p712_p10 = pnand %p711_p9, %p705_p6 }
  0x44   :  { %539 = vmatpush3.bf16.msra.mxu0 %v603_v7  ;;  %559 = vmatpush3.bf16.msra.mxu1 %v612_v12 }
  0x45   :  { %540 = vmatprep.subr.bf16.mxu0 %v738_v0  ;;  %560 = vmatprep.subr.bf16.mxu1 %v738_v0 }
  0x48   :  { %541 = vmatpush3.bf16.msra.mxu0 %v604_v9  ;;  %561 = vmatpush3.bf16.msra.mxu1 %v613_v15 }
  0x49   :  { %542 = vmatprep.subr.bf16.mxu0 %v738_v0  ;;  %562 = vmatprep.subr.bf16.mxu1 %v738_v0 }
  0x4c   :  { %543 = vmatpush3.bf16.msra.mxu0 %v605_v11  ;;  %563 = vmatpush3.bf16.msra.mxu1 %v614_v16 }
  0x4d   :  { %544 = vmatprep.subr.bf16.mxu0 %v738_v0  ;;  %564 = vmatprep.subr.bf16.mxu1 %v738_v0 }
  0x50   :  { %545 = vmatpush3.bf16.msra.mxu0 %v606_v13  ;;  %565 = vmatpush3.bf16.msra.mxu1 %v615_v17 }
  0x51   :  { %570 = vmatprep.subr.bf16.mxu0 %v738_v0 }
  0x53   :  { %547 = vmatmul.mubr.bf16.vlgmr.msra.gmra.mxu0 %v607_v14 }
  0x54   :  { %586 = vmatprep.mubr.msk.bf16.mxu0 %vm739_vm0, %v738_v0  ;;  %571 = vmatpush3.bf16.msra.mxu0 %v616_v18 }
  0x55   :  { %572 = vmatprep.subr.bf16.mxu0 %v738_v0 }
  0x58   :  { %573 = vmatpush3.bf16.msra.mxu0 %v617_v19 }
  0x59   :  { %574 = vmatprep.subr.bf16.mxu0 %v738_v0 }
  0x5c   :  { %575 = vmatpush3.bf16.msra.mxu0 %v618_v20 }
  0x5d   :  { %576 = vmatprep.subr.bf16.mxu0 %v738_v0 }
  0x60   :  { %577 = vmatpush3.bf16.msra.mxu0 %v619_v21 }
  0x61   :  { %578 = vmatprep.subr.bf16.mxu0 %v738_v0 }
  0x64   :  { %579 = vmatpush3.bf16.msra.mxu0 %v620_v22 }
  0x65   :  { %580 = vmatprep.subr.bf16.mxu0 %v738_v0 }
  0x68   :  { %581 = vmatpush3.bf16.msra.mxu0 %v621_v35 }
  0x69   :  { %582 = vmatprep.subr.bf16.mxu0 %v738_v0 }
  0x6c   :  { %583 = vmatpush3.bf16.msra.mxu0 %v622_v36 }
  0x6d   :  { %584 = vmatprep.subr.bf16.mxu0 %v738_v0 }
  0x70   :  { %585 = vmatpush3.bf16.msra.mxu0 %v623_v37 }
 0x113   :  { %v196_v24 = vpop.f32.mrf.mxu0 }
 0x114   :  { %v197_v25 = vadd.f32 %v466_v23, %v196_v24 }
 0x115   :  { %v548_v26 = vpop.f32.mrf.mxu0 }
 0x116   :  { %v203_v28 = vmul.f32 0.2, %v197_v25 }
 0x117   :  { %v199_v27 = vpop.f32.mrf.mxu0 }
 0x118   :  { %v200_v29 = vadd.f32 %v466_v23, %v199_v27  ;;  %v205_v32 = vmax.f32 %v197_v25, %v203_v28 }
 0x119   :  { %v549_v30 = vpop.f32.mrf.mxu0 }
 0x11a   :  { %v204_v31 = vmul.f32 0.2, %v200_v29 }
 0x11c   :  { %v206_v33 = vmax.f32 %v200_v29, %v204_v31 }
 0x11e   :  { %v207_v34 = vpack.c.bf16 %v206_v33, %v205_v32 }
 0x120   :  { %567 = vmatmul.mubr.bf16.vlgmr.msra.gmra.mxu1 %v207_v34 }
 0x1e0   :  { %v313_v39 = vpop.f32.mrf.mxu1 }
 0x1e1   :  { %v314_v40 = vadd.f32 %v476_v38, %v313_v39 }
 0x1e2   :  { %v568_v41 = vpop.f32.mrf.mxu1 }
 0x1e3   :  { %v320_v43 = vmul.f32 0.2, %v314_v40 }
 0x1e4   :  { %v316_v42 = vpop.f32.mrf.mxu1 }
 0x1e5   :  { %v317_v44 = vadd.f32 %v476_v38, %v316_v42  ;;  %v322_v47 = vmax.f32 %v314_v40, %v320_v43 }
 0x1e6   :  { %v569_v45 = vpop.f32.mrf.mxu1 }
 0x1e7   :  { %v321_v46 = vmul.f32 0.2, %v317_v44 }
 0x1e9   :  { %v323_v48 = vmax.f32 %v317_v44, %v321_v46 }
 0x1eb   :  { %v324_v49 = vpack.c.bf16 %v323_v48, %v322_v47 }
 0x1ed   :  { %587 = vmatmul.mubr.bf16.vlgmr.msra.gmra.mxu0 %v324_v49 }
 0x2ad   :  { %v430_v50 = vpop.f32.mrf.mxu0 }
 0x2ae   :  { %v431_v54 = vadd.f32 %v485_v51, %v430_v50 }
 0x2af   :  { %v588_v52 = vpop.f32.mrf.mxu0 }
 0x2b1   :  { %v433_v53 = vpop.f32.mrf.mxu0 }
 0x2b2   :  { %v434_v55 = vadd.f32 %v485_v51, %v433_v53 }
 0x2b3   :  { %v589_v56 = vpop.f32.mrf.mxu0 }
 0x2b4   :  { %v501_v57 = vpack.c.bf16 %v434_v55, %v431_v54 }
 0x2b6   :  { %502 = vst [vmem:[#allocation10] sm:$0xff] %v501_v57  }
 0x2b7   :  { %715 = shalt.err (!%p712_p10)
}
 0x2b8   :  { %458 = dma.vmem_to_hbm [thread:$0]  %s453_s24, 128, %s857_s7, [#allocation4], %s734_s29, %s734_s29, %s735_s30  }
 0x2b9   :  { %730 = dma.done.wait [#allocation4], 128  }
 0x2ba   :  { %731 = vsyncadd [#allocation4], 4294967168 }
 0x2bb   :  { %462 = vsyncpa [#allocation3], 1 }
 0x2bc   :  { %463 = vsyncpa [#allocation6], 1 }
 0x2bd   :  { %464 = vsyncpa [#allocation9], 1 }
 0x2be   :  { %465 = vsyncpa [#allocation4], 1 }

// kernel: tpu_custom_call.1
= control target key start
LH: loop header
LB: loop body
LE: loop exit
PB: predicated region body
PF: predicated region fallthrough
CT: control target
= control target key end

     0   :  { %12 = vsyncpa [#allocation3], 0  ;;  %s850_s0 = inlined_call_operand.hbm [shape: bf16[16,128], index: 0, kind: input, shape index: {}]   ;;  %s851_s1 = inlined_call_operand.hbm [shape: bf16[128,128], index: 1, kind: input, shape index: {}]   ;;  %s852_s2 = inlined_call_operand.vmem [shape: f32[1,128], index: 2, kind: input, shape index: {}]   ;;  %s853_s3 = inlined_call_operand.hbm [shape: bf16[128,128], index: 3, kind: input, shape index: {}]   ;;  %s854_s4 = inlined_call_operand.vmem [shape: f32[1,128], index: 4, kind: input, shape index: {}]   ;;  %s855_s5 = inlined_call_operand.hbm [shape: bf16[128,128], index: 5, kind: input, shape index: {}]   ;;  %s856_s6 = inlined_call_operand.vmem [shape: f32[1,128], index: 6, kind: input, shape index: {}]   ;;  %s857_s7 = inlined_call_operand.hbm [shape: bf16[16,128], index: 7, kind: output, shape index: {}]  }
   0x1   :  { %13 = vsyncpa [#allocation6], 0 }
   0x2   :  { %14 = vsyncpa [#allocation9], 0 }
   0x3   :  { %15 = vsyncpa [#allocation4], 0  ;;  %s732_s24 = smov [#allocation5]   ;;  %s733_s26 = smov [#allocation2]  }
   0x4   :  { %s33_s25 = sshll.u32 %s732_s24, 4  ;;  %s21_s27 = sshll.u32 %s733_s26, 4  ;;  %s34_s25 = int_to_ptr.vmem [resolvable:$true] %s33_s25  ;;  %s22_s27 = int_to_ptr.vmem [resolvable:$true] %s21_s27 }
   0x5   :  { %s632_s28 = scalar_lea.vmem %s34_s25, 1024  ;;  %p637_p1 = scmp.lt.s32.totalorder %s34_s25, %s34_s25 }
   0x6   :  { %p633_p0 = scmp.ne.s32.totalorder %s34_s25, %s632_s28  ;;  %p638_p2 = scmp.lt.s32.totalorder %s632_s28, %s632_s28 }
   0x8   :  { %p639_p3 = por %p638_p2, %p637_p1 }
   0xa   :  { %p640_p4 = pnand %p639_p3, %p633_p0 }
   0xc   :  { %643 = shalt.err (!%p640_p4)
}
   0xd   :  { %s734_s29 = smov 64   ;;  %s735_s30 = smov 4  }
   0xe   :  { %39 = dma.hbm_to_vmem [thread:$0]  %s851_s1, 1024, %s34_s25, [#allocation6], %s734_s29, %s734_s29, %s735_s30  }
   0xf   :  { %s652_s10 = scalar_lea.vmem %s22_s27, 128  ;;  %p657_p6 = scmp.lt.s32.totalorder %s22_s27, %s22_s27 }
  0x10   :  { %p653_p5 = scmp.ne.s32.totalorder %s22_s27, %s652_s10  ;;  %p658_p7 = scmp.lt.s32.totalorder %s652_s10, %s652_s10 }
  0x12   :  { %p659_p8 = por %p658_p7, %p657_p6 }
  0x14   :  { %p660_p9 = pnand %p659_p8, %p653_p5 }
  0x16   :  { %663 = shalt.err (!%p660_p9)
}
  0x17   :  { %27 = dma.hbm_to_vmem [thread:$0]  %s850_s0, 128, %s22_s27, [#allocation3], %s734_s29, %s734_s29, %s735_s30  }
  0x18   :  { %s736_s13 = smov [#allocation7]   ;;  %s737_s15 = smov [#allocation8]  }
  0x19   :  { %s47_s14 = sshll.u32 %s736_s13, 4  ;;  %s61_s16 = sshll.u32 %s737_s15, 4  ;;  %s48_s14 = int_to_ptr.vmem [resolvable:$true] %s47_s14  ;;  %s62_s16 = int_to_ptr.vmem [resolvable:$true] %s61_s16 }
  0x1a   :  { %s672_s1 = scalar_lea.vmem %s48_s14, 1024  ;;  %p677_p11 = scmp.lt.s32.totalorder %s48_s14, %s48_s14 }
  0x1b   :  { %p673_p10 = scmp.ne.s32.totalorder %s48_s14, %s672_s1  ;;  %p678_p12 = scmp.lt.s32.totalorder %s672_s1, %s672_s1 }
  0x1d   :  { %p679_p13 = por %p678_p12, %p677_p11 }
  0x1f   :  { %p680_p0 = pnand %p679_p13, %p673_p10 }
  0x21   :  { %683 = shalt.err (!%p680_p0)
}
  0x22   :  { %53 = dma.hbm_to_vmem [thread:$0]  %s853_s3, 1024, %s48_s14, [#allocation6], %s734_s29, %s734_s29, %s735_s30  }
  0x23   :  { %s692_s0 = scalar_lea.vmem %s62_s16, 1024  ;;  %p697_p2 = scmp.lt.s32.totalorder %s62_s16, %s62_s16 }
  0x24   :  { %p693_p1 = scmp.ne.s32.totalorder %s62_s16, %s692_s0  ;;  %p698_p3 = scmp.lt.s32.totalorder %s692_s0, %s692_s0 }
  0x26   :  { %p699_p4 = por %p698_p3, %p697_p2 }
  0x28   :  { %p700_p5 = pnand %p699_p4, %p693_p1 }
  0x2a   :  { %703 = shalt.err (!%p700_p5)
}
  0x2b   :  { %67 = dma.hbm_to_vmem [thread:$0]  %s855_s5, 1024, %s62_s16, [#allocation9], %s734_s29, %s734_s29, %s735_s30  }
  0x2c   :  { %724 = dma.done.wait [#allocation3], 128  }
  0x2d   :  { %725 = vsyncadd [#allocation3], 4294967168 }
  0x2e   :  { %726 = dma.done.wait [#allocation6], 2048  }
  0x2f   :  { %727 = vsyncadd [#allocation6], 4294965248 }
  0x30   :  { %728 = dma.done.wait [#allocation9], 1024  }
  0x31   :  { %729 = vsyncadd [#allocation9], 4294966272  ;;  %v738_v0 = vmov 0.0   ;;  %vm739_vm0 = vmmov 0   ;;  %v599_v1 = vld [vmem:[#allocation5 + $0x38] sm:$0xff]   ;;  %v600_v2 = vld [vmem:[#allocation5 + $0x30] sm:$0xff]  }
  0x32   :  { %530 = vmatprep.subr.bf16.mxu0 %v738_v0  ;;  %546 = vmatprep.mubr.msk.bf16.mxu0 %vm739_vm0, %v738_v0  ;;  %v601_v3 = vld [vmem:[#allocation5 + $0x28] sm:$0xff]   ;;  %v608_v4 = vld [vmem:[#allocation7 + $0x38] sm:$0xff]   ;;  %v602_v5 = vld [vmem:[#allocation5 + $0x20] sm:$0xff]  }
  0x33   :  { %550 = vmatprep.subr.bf16.mxu1 %v738_v0  ;;  %566 = vmatprep.mubr.msk.bf16.mxu1 %vm739_vm0, %v738_v0  ;;  %v609_v6 = vld [vmem:[#allocation7 + $0x30] sm:$0xff]   ;;  %v603_v7 = vld [vmem:[#allocation5 + $0x18] sm:$0xff]   ;;  %v610_v8 = vld [vmem:[#allocation7 + $0x28] sm:$0xff]  }
  0x34   :  { %531 = vmatpush3.bf16.msra.mxu0 %v599_v1  ;;  %551 = vmatpush3.bf16.msra.mxu1 %v608_v4  ;;  %v604_v9 = vld [vmem:[#allocation5 + $0x10] sm:$0xff]   ;;  %v611_v10 = vld [vmem:[#allocation7 + $0x20] sm:$0xff]   ;;  %v605_v11 = vld [vmem:[#allocation5 + $0x8] sm:$0xff]  }
  0x35   :  { %532 = vmatprep.subr.bf16.mxu0 %v738_v0  ;;  %552 = vmatprep.subr.bf16.mxu1 %v738_v0  ;;  %v612_v12 = vld [vmem:[#allocation7 + $0x18] sm:$0xff]   ;;  %v606_v13 = vld [vmem:[#allocation5] sm:$0xff]   ;;  %v613_v15 = vld [vmem:[#allocation7 + $0x10] sm:$0xff]  }
  0x36   :  { %v607_v14 = vld [vmem:[#allocation2] sm:$0xff]   ;;  %v614_v16 = vld [vmem:[#allocation7 + $0x8] sm:$0xff]   ;;  %v615_v17 = vld [vmem:[#allocation7] sm:$0xff]  }
  0x37   :  { %v616_v18 = vld [vmem:[#allocation8 + $0x38] sm:$0xff]   ;;  %v617_v19 = vld [vmem:[#allocation8 + $0x30] sm:$0xff]   ;;  %v618_v20 = vld [vmem:[#allocation8 + $0x28] sm:$0xff]  }
  0x38   :  { %533 = vmatpush3.bf16.msra.mxu0 %v600_v2  ;;  %553 = vmatpush3.bf16.msra.mxu1 %v609_v6  ;;  %v619_v21 = vld [vmem:[#allocation8 + $0x20] sm:$0xff]   ;;  %v620_v22 = vld [vmem:[#allocation8 + $0x18] sm:$0xff]   ;;  %v621_v35 = vld [vmem:[#allocation8 + $0x10] sm:$0xff]  }
  0x39   :  { %534 = vmatprep.subr.bf16.mxu0 %v738_v0  ;;  %554 = vmatprep.subr.bf16.mxu1 %v738_v0  ;;  %v466_v23 = vld [vmem:[%s852_s2] ss:$0 sm:$0xff]  ;;  %v622_v36 = vld [vmem:[#allocation8 + $0x8] sm:$0xff]   ;;  %v623_v37 = vld [vmem:[#allocation8] sm:$0xff]  }
  0x3a   :  { %v476_v38 = vld [vmem:[%s854_s4] ss:$0 sm:$0xff]  ;;  %s740_s4 = smov [#allocation10]  }
  0x3b   :  { %v485_v51 = vld [vmem:[%s856_s6] ss:$0 sm:$0xff]  ;;  %s452_s24 = sshll.u32 %s740_s4, 4  ;;  %s453_s24 = int_to_ptr.vmem [resolvable:$true] %s452_s24 }
  0x3c   :  { %535 = vmatpush3.bf16.msra.mxu0 %v601_v3  ;;  %555 = vmatpush3.bf16.msra.mxu1 %v610_v8  ;;  %s704_s25 = scalar_lea.vmem %s453_s24, 128  ;;  %p709_p7 = scmp.lt.s32.totalorder %s453_s24, %s453_s24 }
  0x3d   :  { %536 = vmatprep.subr.bf16.mxu0 %v738_v0  ;;  %556 = vmatprep.subr.bf16.mxu1 %v738_v0  ;;  %p705_p6 = scmp.ne.s32.totalorder %s453_s24, %s704_s25  ;;  %p710_p8 = scmp.lt.s32.totalorder %s704_s25, %s704_s25 }
  0x3f   :  { %p711_p9 = por %p710_p8, %p709_p7 }
  0x40   :  { %537 = vmatpush3.bf16.msra.mxu0 %v602_v5  ;;  %557 = vmatpush3.bf16.msra.mxu1 %v611_v10 }
  0x41   :  { %538 = vmatprep.subr.bf16.mxu0 %v738_v0  ;;  %558 = vmatprep.subr.bf16.mxu1 %v738_v0  ;;  %p712_p10 = pnand %p711_p9, %p705_p6 }
  0x44   :  { %539 = vmatpush3.bf16.msra.mxu0 %v603_v7  ;;  %559 = vmatpush3.bf16.msra.mxu1 %v612_v12 }
  0x45   :  { %540 = vmatprep.subr.bf16.mxu0 %v738_v0  ;;  %560 = vmatprep.subr.bf16.mxu1 %v738_v0 }
  0x48   :  { %541 = vmatpush3.bf16.msra.mxu0 %v604_v9  ;;  %561 = vmatpush3.bf16.msra.mxu1 %v613_v15 }
  0x49   :  { %542 = vmatprep.subr.bf16.mxu0 %v738_v0  ;;  %562 = vmatprep.subr.bf16.mxu1 %v738_v0 }
  0x4c   :  { %543 = vmatpush3.bf16.msra.mxu0 %v605_v11  ;;  %563 = vmatpush3.bf16.msra.mxu1 %v614_v16 }
  0x4d   :  { %544 = vmatprep.subr.bf16.mxu0 %v738_v0  ;;  %564 = vmatprep.subr.bf16.mxu1 %v738_v0 }
  0x50   :  { %545 = vmatpush3.bf16.msra.mxu0 %v606_v13  ;;  %565 = vmatpush3.bf16.msra.mxu1 %v615_v17 }
  0x51   :  { %570 = vmatprep.subr.bf16.mxu0 %v738_v0 }
  0x53   :  { %547 = vmatmul.mubr.bf16.vlgmr.msra.gmra.mxu0 %v607_v14 }
  0x54   :  { %586 = vmatprep.mubr.msk.bf16.mxu0 %vm739_vm0, %v738_v0  ;;  %571 = vmatpush3.bf16.msra.mxu0 %v616_v18 }
  0x55   :  { %572 = vmatprep.subr.bf16.mxu0 %v738_v0 }
  0x58   :  { %573 = vmatpush3.bf16.msra.mxu0 %v617_v19 }
  0x59   :  { %574 = vmatprep.subr.bf16.mxu0 %v738_v0 }
  0x5c   :  { %575 = vmatpush3.bf16.msra.mxu0 %v618_v20 }
  0x5d   :  { %576 = vmatprep.subr.bf16.mxu0 %v738_v0 }
  0x60   :  { %577 = vmatpush3.bf16.msra.mxu0 %v619_v21 }
  0x61   :  { %578 = vmatprep.subr.bf16.mxu0 %v738_v0 }
  0x64   :  { %579 = vmatpush3.bf16.msra.mxu0 %v620_v22 }
  0x65   :  { %580 = vmatprep.subr.bf16.mxu0 %v738_v0 }
  0x68   :  { %581 = vmatpush3.bf16.msra.mxu0 %v621_v35 }
  0x69   :  { %582 = vmatprep.subr.bf16.mxu0 %v738_v0 }
  0x6c   :  { %583 = vmatpush3.bf16.msra.mxu0 %v622_v36 }
  0x6d   :  { %584 = vmatprep.subr.bf16.mxu0 %v738_v0 }
  0x70   :  { %585 = vmatpush3.bf16.msra.mxu0 %v623_v37 }
 0x113   :  { %v196_v24 = vpop.f32.mrf.mxu0 }
 0x114   :  { %v197_v25 = vadd.f32 %v466_v23, %v196_v24 }
 0x115   :  { %v548_v26 = vpop.f32.mrf.mxu0 }
 0x116   :  { %v203_v28 = vmul.f32 0.2, %v197_v25 }
 0x117   :  { %v199_v27 = vpop.f32.mrf.mxu0 }
 0x118   :  { %v200_v29 = vadd.f32 %v466_v23, %v199_v27  ;;  %v205_v32 = vmax.f32 %v197_v25, %v203_v28 }
 0x119   :  { %v549_v30 = vpop.f32.mrf.mxu0 }
 0x11a   :  { %v204_v31 = vmul.f32 0.2, %v200_v29 }
 0x11c   :  { %v206_v33 = vmax.f32 %v200_v29, %v204_v31 }
 0x11e   :  { %v207_v34 = vpack.c.bf16 %v206_v33, %v205_v32 }
 0x120   :  { %567 = vmatmul.mubr.bf16.vlgmr.msra.gmra.mxu1 %v207_v34 }
 0x1e0   :  { %v313_v39 = vpop.f32.mrf.mxu1 }
 0x1e1   :  { %v314_v40 = vadd.f32 %v476_v38, %v313_v39 }
 0x1e2   :  { %v568_v41 = vpop.f32.mrf.mxu1 }
 0x1e3   :  { %v320_v43 = vmul.f32 0.2, %v314_v40 }
 0x1e4   :  { %v316_v42 = vpop.f32.mrf.mxu1 }
 0x1e5   :  { %v317_v44 = vadd.f32 %v476_v38, %v316_v42  ;;  %v322_v47 = vmax.f32 %v314_v40, %v320_v43 }
 0x1e6   :  { %v569_v45 = vpop.f32.mrf.mxu1 }
 0x1e7   :  { %v321_v46 = vmul.f32 0.2, %v317_v44 }
 0x1e9   :  { %v323_v48 = vmax.f32 %v317_v44, %v321_v46 }
 0x1eb   :  { %v324_v49 = vpack.c.bf16 %v323_v48, %v322_v47 }
 0x1ed   :  { %587 = vmatmul.mubr.bf16.vlgmr.msra.gmra.mxu0 %v324_v49 }
 0x2ad   :  { %v430_v50 = vpop.f32.mrf.mxu0 }
 0x2ae   :  { %v431_v54 = vadd.f32 %v485_v51, %v430_v50 }
 0x2af   :  { %v588_v52 = vpop.f32.mrf.mxu0 }
 0x2b1   :  { %v433_v53 = vpop.f32.mrf.mxu0 }
 0x2b2   :  { %v434_v55 = vadd.f32 %v485_v51, %v433_v53 }
 0x2b3   :  { %v589_v56 = vpop.f32.mrf.mxu0 }
 0x2b4   :  { %v501_v57 = vpack.c.bf16 %v434_v55, %v431_v54 }
 0x2b6   :  { %502 = vst [vmem:[#allocation10] sm:$0xff] %v501_v57  }
 0x2b7   :  { %715 = shalt.err (!%p712_p10)
}
 0x2b8   :  { %458 = dma.vmem_to_hbm [thread:$0]  %s453_s24, 128, %s857_s7, [#allocation4], %s734_s29, %s734_s29, %s735_s30  }
 0x2b9   :  { %730 = dma.done.wait [#allocation4], 128  }
 0x2ba   :  { %731 = vsyncadd [#allocation4], 4294967168 }
 0x2bb   :  { %462 = vsyncpa [#allocation3], 1 }
 0x2bc   :  { %463 = vsyncpa [#allocation6], 1 }
 0x2bd   :  { %464 = vsyncpa [#allocation9], 1 }
 0x2be   :  { %465 = vsyncpa [#allocation4], 1 }

</bundles_post_ra>
